<compile_context>
chip_gen: v6e
topology: v6e:2x2x1
jax: 0.10.0
libtpu: 0.0.40
codegen_flags: <defaults>
</compile_context>

<pallas_src>
import functools

import jax
import jax.numpy as jnp
from jax.experimental import pallas as pl
from jax.experimental.pallas import tpu as pltpu

EPS = 1e-07
_MAX_ROW_WIDTH = 1024  # lanes per folded row (multiple of 128 preferred)


def _gdice_row_partials_kernel(x_ref, t_ref, st_ref, sx_ref, sxt_ref, *, groups, rg):
    """Per-row partial sums over the lane axis: sum(t), sum(x), sum(x*t)."""

    if groups == 1:
        x = x_ref[...].astype(jnp.float32)
        t = t_ref[...].astype(jnp.float32)
        st_ref[...] = jnp.sum(t, axis=1, keepdims=True)
        sx_ref[...] = jnp.sum(x, axis=1, keepdims=True)
        sxt_ref[...] = jnp.sum(x * t, axis=1, keepdims=True)
    else:
        def body(g, carry):
            r0 = pl.multiple_of(g * rg, rg)
            rows = pl.ds(r0, rg)
            # Each element is loaded from VMEM exactly once; temporaries are
            # chunk (rg x CW) sized, so they live in vregs, not VMEM.
            x = x_ref[rows, :].astype(jnp.float32)
            t = t_ref[rows, :].astype(jnp.float32)
            st_ref[rows, :] = jnp.sum(t, axis=1, keepdims=True)
            sx_ref[rows, :] = jnp.sum(x, axis=1, keepdims=True)
            sxt_ref[rows, :] = jnp.sum(x * t, axis=1, keepdims=True)
            return carry

        jax.lax.fori_loop(0, groups, body, 0, unroll=2)


def _pick_row_width(n):
    """Largest lane-aligned divisor of n up to _MAX_ROW_WIDTH."""
    best = 0
    d = 128
    while d <= min(n, _MAX_ROW_WIDTH):
        if n % d == 0:
            best = d
        d += 128
    if best:
        return best
    if n <= 2 * _MAX_ROW_WIDTH:
        return n
    best = 1
    for d in range(2, _MAX_ROW_WIDTH + 1):
        if n % d == 0:
            best = d
    # TODO(synk): spatial sizes with no usable divisor (e.g. large primes)
    # fall back to very narrow rows; correct but poor lane utilisation.
    return best


def _pick_rows_per_block(r, max_rows):
    """Largest multiple-of-8 divisor of r within the budget (or r itself)."""
    if r <= max_rows:
        return r
    tb = (min(max_rows, r) // 8) * 8
    while tb >= 8:
        if r % tb == 0:
            return tb
        tb -= 8
    # TODO(synk): awkward row counts (no multiple-of-8 divisor fits) fall back
    # to a single oversized block.
    return r


def binary_generalized_dice_loss_v2(inp, tgt, *, tile_bytes=None):
    """inp, tgt: (B, 1, H, W) -> scalar float32 V2 generalized-dice loss.

    Accepts narrow dtypes (e.g. bfloat16) directly; the kernel upcasts per
    chunk, so do NOT pre-cast in the caller (it would just add an HBM pass).
    """
    B, C, H, W = inp.shape
    assert C == 1, "module assumes single-channel probability maps"
    assert tgt.shape == inp.shape
    N = H * W

    isx = jnp.dtype(inp.dtype).itemsize
    ist = jnp.dtype(tgt.dtype).itemsize

    # ---- generation-aware VMEM budget --------------------------------------
    try:
        vmem_cap = int(pltpu.get_tpu_info().vmem_capacity_bytes)
    except Exception:  # pragma: no cover - conservative default
        vmem_cap = 128 << 20
    small_vmem = vmem_cap <= (96 << 20)          # v7x-class (64 MiB per TC)
    if tile_bytes is None:
        tile_bytes = (4 << 20) if small_vmem else (12 << 20)

    # ---- row-fold layout ----------------------------------------------------
    CW = _pick_row_width(N)          # lanes per folded row
    F = N // CW                      # folded rows per sample
    R = B * F                        # total rows

    # Contiguous reshape (no HBM copy), native dtypes preserved.
    x2 = inp.reshape(R, CW)
    t2 = tgt.reshape(R, CW)

    max_rows = max(8, tile_bytes // (CW * max(isx, ist)))
    TB = _pick_rows_per_block(R, max_rows)       # rows per grid block
    num_blocks = R // TB

    if TB % 16 == 0:
        RG = 16
    elif TB % 8 == 0:
        RG = 8
    else:
        RG = TB
    groups = TB // RG

    in_tile_bytes = TB * CW * (isx + ist)
    needed = 2 * in_tile_bytes + 6 * TB * 4 + (4 << 20)   # 2x pipeline + outs + headroom
    cap = (40 << 20) if small_vmem else (96 << 20)
    vmem_limit = int(min(cap, max(16 << 20, needed)))

    kernel = functools.partial(_gdice_row_partials_kernel, groups=groups, rg=RG)

    out_sds = jax.ShapeDtypeStruct((R, 1), jnp.float32)
    row_spec = pl.BlockSpec((TB, CW), lambda i: (i, 0))
    acc_spec = pl.BlockSpec((TB, 1), lambda i: (i, 0))

    st_p, sx_p, sxt_p = pl.pallas_call(
        kernel,
        out_shape=(out_sds, out_sds, out_sds),
        grid_spec=pltpu.PrefetchScalarGridSpec(
            num_scalar_prefetch=0,
            grid=(num_blocks,),
            in_specs=[row_spec, row_spec],
            out_specs=[acc_spec, acc_spec, acc_spec],
        ),
        compiler_params=pltpu.CompilerParams(
            # TODO(synk): on v7x, pltpu.CORE_PARALLEL here would shard the row
            # blocks across both TensorCores; kept "parallel" for portability
            # across v5e/v6e/v7x.
            dimension_semantics=("parallel",),
            vmem_limit_bytes=vmem_limit,
        ),
    )(x2, t2)

    # ---- tiny per-sample finalize (plain JAX, O(B) work) ---------------------
    st = jnp.reshape(st_p, (B, F)).sum(axis=1)    # sum(target)
    sx = jnp.reshape(sx_p, (B, F)).sum(axis=1)    # sum(input)
    sxt = jnp.reshape(sxt_p, (B, F)).sum(axis=1)  # sum(input * target)

    hw = jnp.float32(N)
    n1 = st
    n0 = hw - st
    # Mirrors the PyTorch reference exactly: all-zero / all-one target maps
    # produce inf/NaN (no eps guard in the original module).
    w1 = 1.0 / (n1 * n1)
    w0 = 1.0 / (n0 * n0)
    s_sum = sx + st                   # sum(input + target)
    s_nsum = 2.0 * hw - s_sum         # sum((1-input) + (1-target))
    s_nxt = hw - s_sum + sxt          # sum((1-input) * (1-target))
    wt_int = w1 * sxt + w0 * s_nxt
    wt_un = w1 * s_sum + w0 * s_nsum
    cost = 1.0 - 2.0 * wt_int / (wt_un + EPS)
    # V2 second pass forward(1-x, 1-t) == first pass, so /2 average is a no-op.
    return jnp.sum(cost)


def _reference(inp, tgt):
    """Pure-JAX reference mirroring the PyTorch module exactly."""

    def base(i, t):
        n1 = t.sum((2, 3))
        w1 = 1.0 / (n1 * n1)
        n0 = (1.0 - t).sum((2, 3))
        w0 = 1.0 / (n0 * n0)
        wt_i = w1 * (i * t).sum((2, 3)) + w0 * ((1.0 - i) * (1.0 - t)).sum((2, 3))
        wt_u = w1 * (i + t).sum((2, 3)) + w0 * (1.0 - i + (1.0 - t)).sum((2, 3))
        cost = 1.0 - 2.0 * wt_i / (wt_u + EPS)
        return cost.sum()

    return (base(inp, tgt) + base(1.0 - inp, 1.0 - tgt)) / 2.0


if __name__ == "__main__":
    key = jax.random.PRNGKey(0)
    # (B, H, W, dtype, tile_bytes): cases exercise the full-dim tiny path, a
    # multi-block grid with the fused row-group loop, bf16 + odd batch + fold,
    # and a small-tile multi-block fold path.
    cases = [
        (2, 16, 16, jnp.float32, None),
        (8, 128, 128, jnp.float32, 262144),
        (3, 32, 64, jnp.bfloat16, None),
        (4, 64, 64, jnp.float32, 32768),
    ]
    for idx, (B, H, W, dtype, tb) in enumerate(cases):
        key, k1, k2 = jax.random.split(key, 3)
        inp = jax.random.uniform(k1, (B, 1, H, W), dtype=jnp.float32).astype(dtype)
        tgt = (jax.random.uniform(k2, (B, 1, H, W)) > 0.5).astype(dtype)

        loss = binary_generalized_dice_loss_v2(inp, tgt, tile_bytes=tb)
        loss = jax.block_until_ready(loss)

        ref = _reference(inp.astype(jnp.float32), tgt.astype(jnp.float32))
        assert jnp.allclose(loss, ref, rtol=1e-4, atol=1e-5), (idx, loss, ref)

    print("KERNEL_OK")
</pallas_src>

<mosaic_0001>
module attributes {stable_mosaic.version = 11 : i64} {
  func.func @_gdice_row_partials_kernel(%arg0: i32, %arg1: memref<2x256xf32, #tpu.memory_space<vmem>>, %arg2: memref<2x256xf32, #tpu.memory_space<vmem>>, %arg3: memref<2x1xf32, #tpu.memory_space<vmem>>, %arg4: memref<2x1xf32, #tpu.memory_space<vmem>>, %arg5: memref<2x1xf32, #tpu.memory_space<vmem>>) attributes {dimension_semantics = [#tpu.dimension_semantics<parallel>], iteration_bounds = array<i64: 1>, scalar_prefetch = 0 : i64, scratch_operands = 0 : i64, tpu.core_type = #tpu.core_type<tc>, window_params = [{transform_indices = @transform_0, window_bounds = array<i64: 2, 256>}, {transform_indices = @transform_1, window_bounds = array<i64: 2, 256>}, {transform_indices = @transform_2, window_bounds = array<i64: 2, 1>}, {transform_indices = @transform_3, window_bounds = array<i64: 2, 1>}, {transform_indices = @transform_4, window_bounds = array<i64: 2, 1>}]} {
    %c0 = arith.constant 0 : index
    %c0_0 = arith.constant 0 : index
    %0 = vector.load %arg1[%c0, %c0_0] : memref<2x256xf32, #tpu.memory_space<vmem>>, vector<2x256xf32>
    %c0_1 = arith.constant 0 : index
    %c0_2 = arith.constant 0 : index
    %1 = vector.load %arg2[%c0_1, %c0_2] : memref<2x256xf32, #tpu.memory_space<vmem>>, vector<2x256xf32>
    %cst = arith.constant dense<0.000000e+00> : vector<2xf32>
    %2 = vector.multi_reduction <add>, %1, %cst [1] : vector<2x256xf32> to vector<2xf32>
    %3 = vector.shape_cast %2 : vector<2xf32> to vector<2x1xf32>
    %c0_3 = arith.constant 0 : index
    %c0_4 = arith.constant 0 : index
    %4 = vector.load %arg3[%c0_3, %c0_4] : memref<2x1xf32, #tpu.memory_space<vmem>>, vector<2x1xf32>
    tpu.vector_store %arg3[%c0_3, %c0_4], %3 {strides = array<i32>} : memref<2x1xf32, #tpu.memory_space<vmem>>, vector<2x1xf32>,
    %cst_5 = arith.constant dense<0.000000e+00> : vector<2xf32>
    %5 = vector.multi_reduction <add>, %0, %cst_5 [1] : vector<2x256xf32> to vector<2xf32>
    %6 = vector.shape_cast %5 : vector<2xf32> to vector<2x1xf32>
    %c0_6 = arith.constant 0 : index
    %c0_7 = arith.constant 0 : index
    %7 = vector.load %arg4[%c0_6, %c0_7] : memref<2x1xf32, #tpu.memory_space<vmem>>, vector<2x1xf32>
    tpu.vector_store %arg4[%c0_6, %c0_7], %6 {strides = array<i32>} : memref<2x1xf32, #tpu.memory_space<vmem>>, vector<2x1xf32>,
    %8 = arith.mulf %0, %1 : vector<2x256xf32>
    %cst_8 = arith.constant dense<0.000000e+00> : vector<2xf32>
    %9 = vector.multi_reduction <add>, %8, %cst_8 [1] : vector<2x256xf32> to vector<2xf32>
    %10 = vector.shape_cast %9 : vector<2xf32> to vector<2x1xf32>
    %c0_9 = arith.constant 0 : index
    %c0_10 = arith.constant 0 : index
    %11 = vector.load %arg5[%c0_9, %c0_10] : memref<2x1xf32, #tpu.memory_space<vmem>>, vector<2x1xf32>
    tpu.vector_store %arg5[%c0_9, %c0_10], %10 {strides = array<i32>} : memref<2x1xf32, #tpu.memory_space<vmem>>, vector<2x1xf32>,
    return
  }
  func.func @transform_0(%arg0: i32) -> (i32, i32) {
    %c0_i32 = arith.constant 0 : i32
    %c0_i32_0 = arith.constant 0 : i32
    return %arg0, %c0_i32 : i32, i32
  }
  func.func @transform_1(%arg0: i32) -> (i32, i32) {
    %c0_i32 = arith.constant 0 : i32
    %c0_i32_0 = arith.constant 0 : i32
    return %arg0, %c0_i32 : i32, i32
  }
  func.func @transform_2(%arg0: i32) -> (i32, i32) {
    %c0_i32 = arith.constant 0 : i32
    %c0_i32_0 = arith.constant 0 : i32
    return %arg0, %c0_i32 : i32, i32
  }
  func.func @transform_3(%arg0: i32) -> (i32, i32) {
    %c0_i32 = arith.constant 0 : i32
    %c0_i32_0 = arith.constant 0 : i32
    return %arg0, %c0_i32 : i32, i32
  }
  func.func @transform_4(%arg0: i32) -> (i32, i32) {
    %c0_i32 = arith.constant 0 : i32
    %c0_i32_0 = arith.constant 0 : i32
    return %arg0, %c0_i32 : i32, i32
  }
}

</mosaic_0001>

<bundles_post_ra>
// kernel: tpu_custom_call.1
= control target key start
LH: loop header
LB: loop body
LE: loop exit
PB: predicated region body
PF: predicated region fallthrough
CT: control target
= control target key end

     0   :  { %10 = vsyncpa [#allocation3], 0  ;;  %s198_s0 = inlined_call_operand.hbm [shape: f32[2,256], index: 0, kind: input, shape index: {}]   ;;  %s199_s1 = inlined_call_operand.hbm [shape: f32[2,256], index: 1, kind: input, shape index: {}]   ;;  %s200_s2 = inlined_call_operand.vmem [shape: f32[2,1], index: 2, kind: output, shape index: {0}]   ;;  %s201_s3 = inlined_call_operand.vmem [shape: f32[2,1], index: 3, kind: output, shape index: {1}]   ;;  %s202_s4 = inlined_call_operand.vmem [shape: f32[2,1], index: 4, kind: output, shape index: {2}]  }
   0x1   :  { %11 = vsyncpa [#allocation5], 0  ;;  %s155_s15 = smov [#allocation2]   ;;  %s156_s17 = smov [#allocation4]  }
   0x2   :  { %s18_s16 = sshll.u32 %s155_s15, 4  ;;  %s28_s18 = sshll.u32 %s156_s17, 4  ;;  %s19_s16 = int_to_ptr.vmem [resolvable:$true] %s18_s16  ;;  %s29_s18 = int_to_ptr.vmem [resolvable:$true] %s28_s18 }
   0x3   :  { %s119_s19 = scalar_lea.vmem %s19_s16, 64  ;;  %p124_p1 = scmp.lt.s32.totalorder %s19_s16, %s19_s16 }
   0x4   :  { %p120_p0 = scmp.ne.s32.totalorder %s19_s16, %s119_s19  ;;  %p125_p2 = scmp.lt.s32.totalorder %s119_s19, %s119_s19 }
   0x6   :  { %p126_p3 = por %p125_p2, %p124_p1 }
   0x8   :  { %p127_p4 = pnand %p126_p3, %p120_p0 }
   0xa   :  { %130 = shalt.err (!%p127_p4)
}
   0xb   :  { %21 = dma.hbm_to_vmem [thread:$0]  %s198_s0, 64, %s19_s16, [#allocation3]  }
   0xc   :  { %s139_s22 = scalar_lea.vmem %s29_s18, 64  ;;  %p144_p6 = scmp.lt.s32.totalorder %s29_s18, %s29_s18 }
   0xd   :  { %p140_p5 = scmp.ne.s32.totalorder %s29_s18, %s139_s22  ;;  %p145_p7 = scmp.lt.s32.totalorder %s139_s22, %s139_s22 }
   0xf   :  { %p146_p8 = por %p145_p7, %p144_p6 }
  0x11   :  { %p147_p9 = pnand %p146_p8, %p140_p5 }
  0x13   :  { %150 = shalt.err (!%p147_p9)
}
  0x14   :  { %31 = dma.hbm_to_vmem [thread:$0]  %s199_s1, 64, %s29_s18, [#allocation5]  }
  0x15   :  { %151 = dma.done.wait [#allocation3], 64  }
  0x16   :  { %152 = vsyncadd [#allocation3], 4294967232 }
  0x17   :  { %153 = dma.done.wait [#allocation5], 64  }
  0x18   :  { %154 = vsyncadd [#allocation5], 4294967232  ;;  %v44_v0 = vlaneseq  ;;  %v157_v1 = vmov 1983009808   ;;  %v39_v6 = vld [vmem:[#allocation4] sm:$0xf] }
  0x19   :  { %v42_v2 = vunpack.c.l.s4 %v157_v1  ;;  %vm51_vm0 = vcmask 1041408   ;;  %v38_v7 = vld [vmem:[#allocation2] sm:$0xf]  ;;  %vm57_vm1 = vcmask 1024  }
  0x1a   :  { %v45_v3 = vshrl.u32 %v44_v0, 7  ;;  %v76_v9 = vmul.f32 %v39_v6, %v38_v7 }
  0x1b   :  { %v43_v4 = vunpack.c.0.s8 %v42_v2 }
  0x1d   :  { %v46_v5 = vsub.s32 %v43_v4, %v45_v3 }
  0x1f   :  { %v47_v8 = vrot.slane %v39_v6, %v46_v5  ;;  %v66_v10 = vrot.slane %v38_v7, %v46_v5  ;;  %v84_v13 = vrot.slane %v76_v9, %v46_v5 }
  0x21   :  { %v48_v11 = vcombine.high %v47_v8, %v47_v8  ;;  %v52_v12 = vsel %vm51_vm0, %v47_v8, 0.0  ;;  %v67_v14 = vcombine.high %v66_v10, %v66_v10  ;;  %v70_v15 = vsel %vm51_vm0, %v66_v10, 0.0 }
  0x22   :  { %v85_v17 = vcombine.high %v84_v13, %v84_v13  ;;  %v88_v18 = vsel %vm51_vm0, %v84_v13, 0.0 }
  0x23   :  { %v53_v16 = vsel %vm51_vm0, %v48_v11, 0.0  ;;  %v71_v19 = vsel %vm51_vm0, %v67_v14, 0.0 }
  0x24   :  { %v54_v20 = vadd.f32 %v53_v16, %v52_v12  ;;  %v89_v21 = vsel %vm51_vm0, %v85_v17, 0.0  ;;  %v72_v23 = vadd.f32 %v71_v19, %v70_v15 }
  0x25   :  { %v90_v22 = vadd.f32 %v89_v21, %v88_v18 }
  0x26   :  { %55 = vadd.xlane.f32.xlu0 %v54_v20 }
  0x27   :  { %91 = vadd.xlane.f32.xlu1 %v90_v22 }
  0x2a   :  { %73 = vadd.xlane.f32.xlu0 %v72_v23 }
  0xaf   :  { %v56_v24 = vpop.xlane.xlu0 %55 }
  0xb0   :  { %58 = vst.msk [vmem:[%s200_s2] sm:$0x3] %vm57_vm1, %v56_v24  ;;  %v92_v25 = vpop.xlane.xlu1 %91 }
  0xb1   :  { %93 = vst.msk [vmem:[%s202_s4] sm:$0x3] %vm57_vm1, %v92_v25 }
  0xb3   :  { %v74_v26 = vpop.xlane.xlu0 %73 }
  0xb4   :  { %75 = vst.msk [vmem:[%s201_s3] sm:$0x3] %vm57_vm1, %v74_v26 }
  0xb5   :  { %106 = vsyncpa [#allocation3], 1 }
  0xb6   :  { %107 = vsyncpa [#allocation5], 1 }

</bundles_post_ra>
